<compile_context>
chip_gen: v6e
topology: v6e:2x2x1
jax: 0.10.0
libtpu: 0.0.40
codegen_flags: <defaults>
</compile_context>

<pallas_src>
import functools

import jax
import jax.numpy as jnp
import numpy as np
from jax.experimental import pallas as pl
from jax.experimental.pallas import tpu as pltpu


# ----------------------------------------------------------------------------
# Pallas kernel: one grid step = `bblk` batch elements (Mblk = bblk*T rows).
# ----------------------------------------------------------------------------
def _vit_sc_kernel(x_ref,      # (Mblk, PP)       bf16  tokens
                   we_ref,     # (PP, D)          bf16  linear_embed.weight^T
                   pos_ref,    # (T, D)           f32   pos_embedding + embed bias
                   wqkv_ref,   # (D, 3*D)         bf16  [scale*Wq^T | Wk^T | Wv^T]
                   wo_ref,     # (heads, dh, PP)  bf16  linear_out.weight^T, split per head
                   bo_ref,     # (1, PP)          f32   linear_out.bias
                   o_ref,      # (Mblk, PP)       f32   output tokens
                   *, bblk, T, D, heads, dh):
    M = bblk * T
    x = x_ref[...]                                                    # (M, PP)

    # ---- linear_embed (bias folded into pos) + positional embedding ----
    y = jnp.dot(x, we_ref[...], preferred_element_type=jnp.float32)  # (M, D) f32
    y = (y.reshape(bblk, T, D) + pos_ref[...]).reshape(M, D)

    # ---- fused Q / K / V projection: one tall MXU pass, N = 3*D ----
    # softmax scale is already folded into the Q columns of wqkv.
    qkv = jnp.dot(y.astype(jnp.bfloat16), wqkv_ref[...],
                  preferred_element_type=jnp.float32)                 # (M, 3D) f32

    # ---- per-head attention + per-head output projection (heads is 1 or 2) ----
    out = None
    for h in range(heads):                                            # static unroll
        qh = qkv[:, h * dh:(h + 1) * dh].reshape(bblk, T, dh)
        kh = qkv[:, D + h * dh:D + (h + 1) * dh].reshape(bblk, T, dh)
        vh = qkv[:, 2 * D + h * dh:2 * D + (h + 1) * dh].reshape(bblk, T, dh)

        dots = jnp.einsum('bqd,bkd->bqk',
                          qh.astype(jnp.bfloat16), kh.astype(jnp.bfloat16),
                          preferred_element_type=jnp.float32)         # (bblk, T, T)
        # stable softmax in f32 on VPU/EUP
        dots = dots - jnp.max(dots, axis=-1, keepdims=True)
        p = jnp.exp(dots)
        attn = p * pl.reciprocal(jnp.sum(p, axis=-1, keepdims=True), approx=True)

        oh = jnp.einsum('bqk,bkd->bqd',
                        attn.astype(jnp.bfloat16), vh.astype(jnp.bfloat16),
                        preferred_element_type=jnp.float32)           # (bblk, T, dh)

        # project this head's output directly (avoids lane concat of heads)
        ph = jnp.dot(oh.reshape(M, dh).astype(jnp.bfloat16), wo_ref[h],
                     preferred_element_type=jnp.float32)              # (M, PP)
        out = ph if out is None else out + ph

    o_ref[...] = (out + bo_ref[...]).astype(o_ref.dtype)


def _choose_block_batch(BN, T, target_rows=512):
    """Largest divisor d of BN with d*T <= target_rows, d*T % 8 == 0 and >=2 steps."""
    best = BN                      # fallback: whole batch, block == full array
    for d in range(1, BN + 1):
        if BN % d or (d * T) % 8:
            continue
        if d * T > target_rows:
            break
        if BN // d >= 2 or BN == 1:
            best = d
    return best


# ----------------------------------------------------------------------------
# Wrapper: unfold / fold glue + pallas_call
# ----------------------------------------------------------------------------
def vit_spatiochannel(x, params, *, image_size, patch_size, nf, block_batch=None):
    B, N, C, H, W = x.shape
    assert N == 1 and H == W == image_size and C == nf
    P = patch_size
    G = H // P
    Np = G * G
    PP = P * P
    D = min(64, PP)
    heads = max(1, D // 32)
    dh = D // heads
    T = Np * C
    BN = B * N
    scale = float(dh) ** -0.5

    # --- unfold (F.unfold, kernel=stride=P) + token reshape, in plain JAX ---
    xt = x.reshape(BN, C, G, P, G, P)
    xt = xt.transpose(0, 2, 4, 1, 3, 5)                 # (BN, gh, gw, C, P, P)
    xt = xt.reshape(BN * T, PP).astype(jnp.bfloat16)    # tokens, tall 2-D layout

    # --- constant-folded / fused weights (bf16 MXU operands, f32 biases) ---
    we_t = params["we"].T.astype(jnp.bfloat16)                               # (PP, D)
    pos_bias = (params["pos"].reshape(T, D)
                + params["be"].reshape(1, D)).astype(jnp.float32)            # (T, D)
    wqkv_t = jnp.concatenate(
        [params["wq"].T * scale, params["wk"].T, params["wv"].T], axis=1
    ).astype(jnp.bfloat16)                                                   # (D, 3D)
    wo_h = params["wo"].T.reshape(heads, dh, PP).astype(jnp.bfloat16)        # (heads, dh, PP)
    bo = params["bo"].reshape(1, PP).astype(jnp.float32)

    # --- block-batch choice: tall M per step, >=2 steps (megacore) when possible ---
    bblk = block_batch if block_batch is not None else _choose_block_batch(BN, T)
    assert BN % bblk == 0
    Mblk = bblk * T
    grid = (BN // bblk,)

    kern = functools.partial(_vit_sc_kernel, bblk=bblk, T=T, D=D,
                             heads=heads, dh=dh)

    flops = BN * (2 * T * PP * D + 2 * T * D * 3 * D
                  + heads * (4 * T * T * dh) + 2 * T * D * PP)
    bytes_accessed = int(xt.size * 2 + BN * T * PP * 4 + we_t.size * 2
                         + wqkv_t.size * 2 + wo_h.size * 2
                         + pos_bias.size * 4 + bo.size * 4)
    cost = pl.CostEstimate(flops=int(flops),
                           transcendentals=int(BN * heads * T * T),
                           bytes_accessed=bytes_accessed)

    out_tokens = pl.pallas_call(
        kern,
        out_shape=jax.ShapeDtypeStruct((BN * T, PP), jnp.float32),
        grid=grid,
        in_specs=[
            pl.BlockSpec((Mblk, PP), lambda i: (i, 0)),
            pl.BlockSpec(we_t.shape, lambda i: (0, 0)),
            pl.BlockSpec(pos_bias.shape, lambda i: (0, 0)),
            pl.BlockSpec(wqkv_t.shape, lambda i: (0, 0)),
            pl.BlockSpec(wo_h.shape, lambda i: (0, 0, 0)),
            pl.BlockSpec(bo.shape, lambda i: (0, 0)),
        ],
        out_specs=pl.BlockSpec((Mblk, PP), lambda i: (i, 0)),
        compiler_params=pltpu.CompilerParams(
            dimension_semantics=("parallel",)),
        cost_estimate=cost,
    )(xt, we_t, pos_bias, wqkv_t, wo_h, bo)

    # --- fold (F.fold, kernel=stride=P, no overlap) ---
    out = out_tokens.reshape(BN, G, G, C, P, P)
    out = out.transpose(0, 3, 1, 4, 2, 5)               # (BN, C, gh, P, gw, P)
    out = out.reshape(B, N, C, H, W)
    return out


# ----------------------------------------------------------------------------
# Pure-JAX f32 reference (mirrors the PyTorch forward) for verification.
# ----------------------------------------------------------------------------
def _reference(x, params, *, image_size, patch_size, nf):
    B, N, C, H, W = x.shape
    P = patch_size
    G = H // P
    Np = G * G
    PP = P * P
    D = min(64, PP)
    heads = max(1, D // 32)
    dh = D // heads
    T = Np * C
    BN = B * N

    xt = x.reshape(BN, C, G, P, G, P).transpose(0, 2, 4, 1, 3, 5).reshape(BN, T, PP)
    y = xt @ params["we"].T + params["be"] + params["pos"].reshape(1, T, D)

    def split_heads(w):
        return (y @ w.T).reshape(BN, T, heads, dh).transpose(0, 2, 1, 3)

    q = split_heads(params["wq"])
    k = split_heads(params["wk"])
    v = split_heads(params["wv"])
    dots = jnp.einsum('bhqd,bhkd->bhqk', q, k) * (dh ** -0.5)
    attn = jax.nn.softmax(dots, axis=-1)
    out = jnp.einsum('bhqk,bhkd->bhqd', attn, v)
    out = out.transpose(0, 2, 1, 3).reshape(BN, T, D)
    out = out @ params["wo"].T + params["bo"]
    out = out.reshape(BN, G, G, C, P, P).transpose(0, 3, 1, 4, 2, 5)
    return out.reshape(B, N, C, H, W)


# ----------------------------------------------------------------------------
if __name__ == "__main__":
    B, N, C = 8, 1, 4
    image_size, patch_size = 16, 8
    nf = C
    PP = patch_size ** 2
    D = min(64, PP)
    T = ((image_size // patch_size) ** 2) * nf

    key = jax.random.PRNGKey(0)
    ks = jax.random.split(key, 9)
    params = {
        "we": jax.random.normal(ks[0], (D, PP), jnp.float32) * 0.05,
        "be": jax.random.normal(ks[1], (D,), jnp.float32) * 0.05,
        "pos": jax.random.normal(ks[2], (1, T, D), jnp.float32) * 0.05,
        "wq": jax.random.normal(ks[3], (D, D), jnp.float32) * 0.05,
        "wk": jax.random.normal(ks[4], (D, D), jnp.float32) * 0.05,
        "wv": jax.random.normal(ks[5], (D, D), jnp.float32) * 0.05,
        "wo": jax.random.normal(ks[6], (PP, D), jnp.float32) * 0.05,
        "bo": jax.random.normal(ks[7], (PP,), jnp.float32) * 0.05,
    }
    x = jax.random.normal(ks[8], (B, N, C, image_size, image_size), jnp.float32)

    run = jax.jit(functools.partial(vit_spatiochannel,
                                    image_size=image_size,
                                    patch_size=patch_size, nf=nf))
    out = jax.block_until_ready(run(x, params))

    ref = _reference(x, params, image_size=image_size,
                     patch_size=patch_size, nf=nf)
    # bf16 MXU operands (f32 accumulation) -> tolerance looser than pure f32.
    np.testing.assert_allclose(np.asarray(out), np.asarray(ref),
                               rtol=2e-2, atol=2e-2)
    assert out.shape == (B, N, C, image_size, image_size)
    print("KERNEL_OK")
</pallas_src>

<mosaic_0001>
module attributes {stable_mosaic.version = 11 : i64} {
  func.func @_vit_sc_kernel(%arg0: i32, %arg1: memref<64x64xbf16, #tpu.memory_space<vmem>>, %arg2: memref<64x64xbf16, #tpu.memory_space<vmem>>, %arg3: memref<16x64xf32, #tpu.memory_space<vmem>>, %arg4: memref<64x192xbf16, #tpu.memory_space<vmem>>, %arg5: memref<2x32x64xbf16, #tpu.memory_space<vmem>>, %arg6: memref<1x64xf32, #tpu.memory_space<vmem>>, %arg7: memref<64x64xf32, #tpu.memory_space<vmem>>) attributes {dimension_semantics = [#tpu.dimension_semantics<parallel>], iteration_bounds = array<i64: 2>, scalar_prefetch = 0 : i64, scratch_operands = 0 : i64, tpu.core_type = #tpu.core_type<tc>, window_params = [{transform_indices = @transform_0, window_bounds = array<i64: 64, 64>}, {pipeline_mode = #tpu.pipeline_mode<synchronous>, transform_indices = @transform_1, window_bounds = array<i64: 64, 64>}, {pipeline_mode = #tpu.pipeline_mode<synchronous>, transform_indices = @transform_2, window_bounds = array<i64: 16, 64>}, {pipeline_mode = #tpu.pipeline_mode<synchronous>, transform_indices = @transform_3, window_bounds = array<i64: 64, 192>}, {pipeline_mode = #tpu.pipeline_mode<synchronous>, transform_indices = @transform_4, window_bounds = array<i64: 2, 32, 64>}, {pipeline_mode = #tpu.pipeline_mode<synchronous>, transform_indices = @transform_5, window_bounds = array<i64: 1, 64>}, {transform_indices = @transform_6, window_bounds = array<i64: 64, 64>}]} {
    %c0 = arith.constant 0 : index
    %c0_0 = arith.constant 0 : index
    %0 = vector.load %arg1[%c0, %c0_0] : memref<64x64xbf16, #tpu.memory_space<vmem>>, vector<64x64xbf16>
    %c0_1 = arith.constant 0 : index
    %c0_2 = arith.constant 0 : index
    %1 = vector.load %arg2[%c0_1, %c0_2] : memref<64x64xbf16, #tpu.memory_space<vmem>>, vector<64x64xbf16>
    %cst = arith.constant dense<0.000000e+00> : vector<64x64xf32>
    %2 = tpu.matmul %0, %1, %cst {dimension_numbers = #tpu.dot_dimension_numbers<[1], [0], [0], [1], [0, 0, 1, 1], [], []>} : vector<64x64xbf16>, vector<64x64xbf16>, vector<64x64xf32> -> vector<64x64xf32>
    %3 = vector.shape_cast %2 : vector<64x64xf32> to vector<4x16x64xf32>
    %c0_3 = arith.constant 0 : index
    %c0_4 = arith.constant 0 : index
    %4 = vector.load %arg3[%c0_3, %c0_4] : memref<16x64xf32, #tpu.memory_space<vmem>>, vector<16x64xf32>
    %5 = vector.shape_cast %4 : vector<16x64xf32> to vector<1x16x64xf32>
    %6 = vector.broadcast %5 : vector<1x16x64xf32> to vector<4x16x64xf32>
    %7 = arith.addf %3, %6 : vector<4x16x64xf32>
    %8 = vector.shape_cast %7 : vector<4x16x64xf32> to vector<64x64xf32>
    %9 = arith.truncf %8 : vector<64x64xf32> to vector<64x64xbf16>
    %c0_5 = arith.constant 0 : index
    %c0_6 = arith.constant 0 : index
    %10 = vector.load %arg4[%c0_5, %c0_6] : memref<64x192xbf16, #tpu.memory_space<vmem>>, vector<64x192xbf16>
    %cst_7 = arith.constant dense<0.000000e+00> : vector<64x192xf32>
    %11 = tpu.matmul %9, %10, %cst_7 {dimension_numbers = #tpu.dot_dimension_numbers<[1], [0], [0], [1], [0, 0, 1, 1], [], []>} : vector<64x64xbf16>, vector<64x192xbf16>, vector<64x192xf32> -> vector<64x192xf32>
    %12 = vector.extract_strided_slice %11 {offsets = [0, 0], sizes = [64, 32], strides = [1, 1]} : vector<64x192xf32> to vector<64x32xf32>
    %13 = vector.shape_cast %12 : vector<64x32xf32> to vector<4x16x32xf32>
    %14 = vector.extract_strided_slice %11 {offsets = [0, 64], sizes = [64, 32], strides = [1, 1]} : vector<64x192xf32> to vector<64x32xf32>
    %15 = vector.shape_cast %14 : vector<64x32xf32> to vector<4x16x32xf32>
    %16 = vector.extract_strided_slice %11 {offsets = [0, 128], sizes = [64, 32], strides = [1, 1]} : vector<64x192xf32> to vector<64x32xf32>
    %17 = vector.shape_cast %16 : vector<64x32xf32> to vector<4x16x32xf32>
    %18 = arith.truncf %13 : vector<4x16x32xf32> to vector<4x16x32xbf16>
    %19 = arith.truncf %15 : vector<4x16x32xf32> to vector<4x16x32xbf16>
    "tpu.trace_start"() <{level = 10 : i32, message = "bqd,bkd->bqk"}> : () -> ()
    %cst_8 = arith.constant dense<0.000000e+00> : vector<4x16x16xf32>
    %20 = tpu.matmul %18, %19, %cst_8 {dimension_numbers = #tpu.dot_dimension_numbers<[2], [2], [1], [1], [0, 0, 0, 1, 1, 1], [0], [0]>} : vector<4x16x32xbf16>, vector<4x16x32xbf16>, vector<4x16x16xf32> -> vector<4x16x16xf32>
    "tpu.trace_stop"() : () -> ()
    %cst_9 = arith.constant dense<0xFF800000> : vector<4x16xf32>
    %21 = vector.multi_reduction <maximumf>, %20, %cst_9 [2] : vector<4x16x16xf32> to vector<4x16xf32>
    %22 = vector.shape_cast %21 : vector<4x16xf32> to vector<4x16x1xf32>
    %23 = vector.broadcast %22 : vector<4x16x1xf32> to vector<4x16x16xf32>
    %24 = arith.subf %20, %23 : vector<4x16x16xf32>
    %25 = math.exp %24 : vector<4x16x16xf32>
    %cst_10 = arith.constant dense<0.000000e+00> : vector<4x16xf32>
    %26 = vector.multi_reduction <add>, %25, %cst_10 [2] : vector<4x16x16xf32> to vector<4x16xf32>
    %27 = vector.shape_cast %26 : vector<4x16xf32> to vector<4x16x1xf32>
    %28 = tpu.reciprocal %27 {approx = true} : vector<4x16x1xf32> -> vector<4x16x1xf32>
    %29 = vector.broadcast %28 : vector<4x16x1xf32> to vector<4x16x16xf32>
    %30 = arith.mulf %25, %29 : vector<4x16x16xf32>
    %31 = arith.truncf %30 : vector<4x16x16xf32> to vector<4x16x16xbf16>
    %32 = arith.truncf %17 : vector<4x16x32xf32> to vector<4x16x32xbf16>
    "tpu.trace_start"() <{level = 10 : i32, message = "bqk,bkd->bqd"}> : () -> ()
    %cst_11 = arith.constant dense<0.000000e+00> : vector<4x16x32xf32>
    %33 = tpu.matmul %31, %32, %cst_11 {dimension_numbers = #tpu.dot_dimension_numbers<[2], [1], [1], [2], [0, 0, 0, 1, 1, 2], [0], [0]>} : vector<4x16x16xbf16>, vector<4x16x32xbf16>, vector<4x16x32xf32> -> vector<4x16x32xf32>
    "tpu.trace_stop"() : () -> ()
    %34 = vector.shape_cast %33 : vector<4x16x32xf32> to vector<64x32xf32>
    %35 = arith.truncf %34 : vector<64x32xf32> to vector<64x32xbf16>
    %c0_12 = arith.constant 0 : index
    %c0_13 = arith.constant 0 : index
    %c0_14 = arith.constant 0 : index
    %36 = vector.load %arg5[%c0_12, %c0_13, %c0_14] : memref<2x32x64xbf16, #tpu.memory_space<vmem>>, vector<1x32x64xbf16>
    %37 = vector.shape_cast %36 : vector<1x32x64xbf16> to vector<32x64xbf16>
    %cst_15 = arith.constant dense<0.000000e+00> : vector<64x64xf32>
    %38 = tpu.matmul %35, %37, %cst_15 {dimension_numbers = #tpu.dot_dimension_numbers<[1], [0], [0], [1], [0, 0, 1, 1], [], []>} : vector<64x32xbf16>, vector<32x64xbf16>, vector<64x64xf32> -> vector<64x64xf32>
    %39 = vector.extract_strided_slice %11 {offsets = [0, 32], sizes = [64, 32], strides = [1, 1]} : vector<64x192xf32> to vector<64x32xf32>
    %40 = vector.shape_cast %39 : vector<64x32xf32> to vector<4x16x32xf32>
    %41 = vector.extract_strided_slice %11 {offsets = [0, 96], sizes = [64, 32], strides = [1, 1]} : vector<64x192xf32> to vector<64x32xf32>
    %42 = vector.shape_cast %41 : vector<64x32xf32> to vector<4x16x32xf32>
    %43 = vector.extract_strided_slice %11 {offsets = [0, 160], sizes = [64, 32], strides = [1, 1]} : vector<64x192xf32> to vector<64x32xf32>
    %44 = vector.shape_cast %43 : vector<64x32xf32> to vector<4x16x32xf32>
    %45 = arith.truncf %40 : vector<4x16x32xf32> to vector<4x16x32xbf16>
    %46 = arith.truncf %42 : vector<4x16x32xf32> to vector<4x16x32xbf16>
    "tpu.trace_start"() <{level = 10 : i32, message = "bqd,bkd->bqk"}> : () -> ()
    %cst_16 = arith.constant dense<0.000000e+00> : vector<4x16x16xf32>
    %47 = tpu.matmul %45, %46, %cst_16 {dimension_numbers = #tpu.dot_dimension_numbers<[2], [2], [1], [1], [0, 0, 0, 1, 1, 1], [0], [0]>} : vector<4x16x32xbf16>, vector<4x16x32xbf16>, vector<4x16x16xf32> -> vector<4x16x16xf32>
    "tpu.trace_stop"() : () -> ()
    %cst_17 = arith.constant dense<0xFF800000> : vector<4x16xf32>
    %48 = vector.multi_reduction <maximumf>, %47, %cst_17 [2] : vector<4x16x16xf32> to vector<4x16xf32>
    %49 = vector.shape_cast %48 : vector<4x16xf32> to vector<4x16x1xf32>
    %50 = vector.broadcast %49 : vector<4x16x1xf32> to vector<4x16x16xf32>
    %51 = arith.subf %47, %50 : vector<4x16x16xf32>
    %52 = math.exp %51 : vector<4x16x16xf32>
    %cst_18 = arith.constant dense<0.000000e+00> : vector<4x16xf32>
    %53 = vector.multi_reduction <add>, %52, %cst_18 [2] : vector<4x16x16xf32> to vector<4x16xf32>
    %54 = vector.shape_cast %53 : vector<4x16xf32> to vector<4x16x1xf32>
    %55 = tpu.reciprocal %54 {approx = true} : vector<4x16x1xf32> -> vector<4x16x1xf32>
    %56 = vector.broadcast %55 : vector<4x16x1xf32> to vector<4x16x16xf32>
    %57 = arith.mulf %52, %56 : vector<4x16x16xf32>
    %58 = arith.truncf %57 : vector<4x16x16xf32> to vector<4x16x16xbf16>
    %59 = arith.truncf %44 : vector<4x16x32xf32> to vector<4x16x32xbf16>
    "tpu.trace_start"() <{level = 10 : i32, message = "bqk,bkd->bqd"}> : () -> ()
    %cst_19 = arith.constant dense<0.000000e+00> : vector<4x16x32xf32>
    %60 = tpu.matmul %58, %59, %cst_19 {dimension_numbers = #tpu.dot_dimension_numbers<[2], [1], [1], [2], [0, 0, 0, 1, 1, 2], [0], [0]>} : vector<4x16x16xbf16>, vector<4x16x32xbf16>, vector<4x16x32xf32> -> vector<4x16x32xf32>
    "tpu.trace_stop"() : () -> ()
    %61 = vector.shape_cast %60 : vector<4x16x32xf32> to vector<64x32xf32>
    %62 = arith.truncf %61 : vector<64x32xf32> to vector<64x32xbf16>
    %c1 = arith.constant 1 : index
    %c0_20 = arith.constant 0 : index
    %c0_21 = arith.constant 0 : index
    %63 = vector.load %arg5[%c1, %c0_20, %c0_21] : memref<2x32x64xbf16, #tpu.memory_space<vmem>>, vector<1x32x64xbf16>
    %64 = vector.shape_cast %63 : vector<1x32x64xbf16> to vector<32x64xbf16>
    %cst_22 = arith.constant dense<0.000000e+00> : vector<64x64xf32>
    %65 = tpu.matmul %62, %64, %cst_22 {dimension_numbers = #tpu.dot_dimension_numbers<[1], [0], [0], [1], [0, 0, 1, 1], [], []>} : vector<64x32xbf16>, vector<32x64xbf16>, vector<64x64xf32> -> vector<64x64xf32>
    %66 = arith.addf %38, %65 : vector<64x64xf32>
    %c0_23 = arith.constant 0 : index
    %c0_24 = arith.constant 0 : index
    %67 = vector.load %arg6[%c0_23, %c0_24] : memref<1x64xf32, #tpu.memory_space<vmem>>, vector<1x64xf32>
    %68 = vector.broadcast %67 : vector<1x64xf32> to vector<64x64xf32>
    %69 = arith.addf %66, %68 : vector<64x64xf32>
    %c0_25 = arith.constant 0 : index
    %c0_26 = arith.constant 0 : index
    %70 = vector.load %arg7[%c0_25, %c0_26] : memref<64x64xf32, #tpu.memory_space<vmem>>, vector<64x64xf32>
    tpu.vector_store %arg7[%c0_25, %c0_26], %69 {strides = array<i32>} : memref<64x64xf32, #tpu.memory_space<vmem>>, vector<64x64xf32>,
    return
  }
  func.func @transform_0(%arg0: i32) -> (i32, i32) {
    %c0_i32 = arith.constant 0 : i32
    %c0_i32_0 = arith.constant 0 : i32
    return %arg0, %c0_i32 : i32, i32
  }
  func.func @transform_1(%arg0: i32) -> (i32, i32) {
    %c0_i32 = arith.constant 0 : i32
    %c0_i32_0 = arith.constant 0 : i32
    %c0_i32_1 = arith.constant 0 : i32
    return %c0_i32, %c0_i32_0 : i32, i32
  }
  func.func @transform_2(%arg0: i32) -> (i32, i32) {
    %c0_i32 = arith.constant 0 : i32
    %c0_i32_0 = arith.constant 0 : i32
    %c0_i32_1 = arith.constant 0 : i32
    return %c0_i32, %c0_i32_0 : i32, i32
  }
  func.func @transform_3(%arg0: i32) -> (i32, i32) {
    %c0_i32 = arith.constant 0 : i32
    %c0_i32_0 = arith.constant 0 : i32
    %c0_i32_1 = arith.constant 0 : i32
    return %c0_i32, %c0_i32_0 : i32, i32
  }
  func.func @transform_4(%arg0: i32) -> (i32, i32, i32) {
    %c0_i32 = arith.constant 0 : i32
    %c0_i32_0 = arith.constant 0 : i32
    %c0_i32_1 = arith.constant 0 : i32
    %c0_i32_2 = arith.constant 0 : i32
    return %c0_i32, %c0_i32_0, %c0_i32_1 : i32, i32, i32
  }
  func.func @transform_5(%arg0: i32) -> (i32, i32) {
    %c0_i32 = arith.constant 0 : i32
    %c0_i32_0 = arith.constant 0 : i32
    %c0_i32_1 = arith.constant 0 : i32
    return %c0_i32, %c0_i32_0 : i32, i32
  }
  func.func @transform_6(%arg0: i32) -> (i32, i32) {
    %c0_i32 = arith.constant 0 : i32
    %c0_i32_0 = arith.constant 0 : i32
    return %arg0, %c0_i32 : i32, i32
  }
}

</mosaic_0001>

<bundles_post_ra>
// kernel: vit_spatiochannel.1
= control target key start
LH: loop header
LB: loop body
LE: loop exit
PB: predicated region body
PF: predicated region fallthrough
CT: control target
= control target key end

     0   :  { %s2188_s21 = smov 0   ;;  %s2502_s0 = inlined_call_operand.vmem [shape: bf16[128,64], index: 0, kind: input, shape index: {}]   ;;  %s2503_s1 = inlined_call_operand.vmem [shape: bf16[64,64], index: 1, kind: input, shape index: {}]   ;;  %s2504_s2 = inlined_call_operand.vmem [shape: f32[16,64], index: 2, kind: input, shape index: {}]   ;;  %s2505_s3 = inlined_call_operand.vmem [shape: bf16[64,192], index: 3, kind: input, shape index: {}]   ;;  %s2506_s4 = inlined_call_operand.vmem [shape: bf16[2,32,64], index: 4, kind: input, shape index: {}]   ;;  %s2507_s5 = inlined_call_operand.vmem [shape: f32[1,64], index: 5, kind: input, shape index: {}]   ;;  %s2508_s6 = inlined_call_operand.vmem [shape: f32[128,64], index: 6, kind: output, shape index: {}]  }
   0x1 LB: > { %s1781_s22 = sadd.s32 4294967295, %s2145_s21   ;;  %p1785_p0 = scmp.ge.s32.totalorder %s2145_s21, 1  ;;  %s2145_s21 = sphi %s2188_s21, %s16_s21  }
   0x2   : > { %p213_p1 = scmp.lt.s32.totalorder %s2145_s21, 3 }
   0x4   : > { %p214_p2 = pnand %p1785_p0, %p213_p1 }
   0x5   : > { %s1786_s25 = sshll.u32 (!%p214_p2), %s1781_s22, 3  ;;  %s2150_s10 = smov (!%p214_p2), 64  }
   0x6   : > { %217 = sbr.rel (%p214_p2) target bundleno = 2018 (0x7e2), region = 44  ;;  %p244_p3 = scmp.lt.s32.totalorder (!%p214_p2), %s1786_s25, 15 }
   0x7   : > { %s2151_s11 = smov (!%p214_p2), 32   ;;  %s2152_s12 = smov (!%p214_p2), 96  }
   0xb   : > { %v2051_v0 = vld [vmem:[%s2503_s1 + $0x18] sm:$0xff]   ;;  %v2052_v1 = vld [vmem:[%s2503_s1 + $0x10] sm:$0xff]   ;;  %v2053_v2 = vld [vmem:[%s2503_s1 + $0x8] sm:$0xff]   ;;  %s2510_s25 = smov (!%p244_p3, %s1786_s25), 15  ;;  %vm316_vm0 = vcmask 523264   ;;  %v2147_v16 = vmov 0  }
   0xc   : > { %1901 = vmatprep.subr.bf16.mxu0 %v2051_v0  ;;  %v2059_v3 = vld [vmem:[%s2505_s3 + $0x34] ss:$8 sps:$4 sm:$0xff]   ;;  %s1787_s8 = sshll.u32 %s2510_s25, 2  ;;  %v2061_v4 = vld [vmem:[%s2505_s3 + $0x30] ss:$8 sps:$4 sm:$0xff]   ;;  %v2054_v7 = vld [vmem:[%s2503_s1] sm:$0xff]   ;;  %500 = vmatprep.mubr.bf16.mxu1 %v2147_v16 }
   0xd   : > { %1902 = vmatpush3.bf16.msra.mxu0 %v2051_v0  ;;  %s247_s13 = scalar_lea.vmem %s2502_s0, %s1787_s8  ;;  %476 = vmatprep.subr.bf16.mxu1 %v2059_v3  ;;  %v2062_v5 = vld [vmem:[%s2505_s3 + $0x24] ss:$8 sps:$4 sm:$0xff]   ;;  %v2064_v11 = vld [vmem:[%s2505_s3 + $0x20] ss:$8 sps:$4 sm:$0xff]   ;;  %v2065_v12 = vld [vmem:[%s2505_s3 + $0x14] ss:$8 sps:$4 sm:$0xff]  }
   0xe   : > { %1903 = vmatprep.subr.bf16.mxu0 %v2052_v1  ;;  %v2055_v6 = vld [vmem:[%s247_s13] sm:$0xff]   ;;  %477 = vmatpush1.bf16.msra.mxu1 %v2061_v4  ;;  %v2056_v8 = vld [vmem:[%s247_s13 + $0x8] sm:$0xff]   ;;  %v2057_v9 = vld [vmem:[%s247_s13 + $0x10] sm:$0xff]   ;;  %v2148_v39 = vmov 0.0   ;;  %vm2149_vm1 = vmmov 0   ;;  %vm548_vm2 = vcmask 261120  }
   0xf   : > { %478 = vmatprep.subr.bf16.mxu1 %v2062_v5  ;;  %1909 = vmatprep.mubr.msk.bf16.mxu0 %vm316_vm0, %v2055_v6  ;;  %v2058_v10 = vld [vmem:[%s247_s13 + $0x18] sm:$0xff]   ;;  %v2068_v14 = vld [vmem:[%s2505_s3 + $0x4] ss:$8 sps:$4 sm:$0xff]   ;;  %v2070_v15 = vld [vmem:[%s2505_s3] ss:$8 sps:$4 sm:$0xff]   ;;  %vm746_vm3 = vcmask 130048  }
  0x10   : > { %v2067_v13 = vld [vmem:[%s2505_s3 + $0x10] ss:$8 sps:$4 sm:$0xff]   ;;  %v394_v20 = vld [vmem:[%s2504_s2] sm:$0xff]  ;;  %v395_v21 = vld [vmem:[%s2504_s2 + $0x8] sm:$0xff]  ;;  %s1789_s22 = sshll.u32 %s2510_s25, 3 }
  0x11   : > { %1904 = vmatpush3.bf16.msra.mxu0 %v2052_v1  ;;  %s2481_s28 = scalar_lea.vmem %s2508_s6, %s1789_s22 }
  0x12   : > { %1905 = vmatprep.subr.bf16.mxu0 %v2053_v2  ;;  %479 = vmatpush1.bf16.msra.mxu1 %v2064_v11 }
  0x13   : > { %480 = vmatprep.subr.bf16.mxu1 %v2065_v12 }
  0x15   : > { %1906 = vmatpush3.bf16.msra.mxu0 %v2053_v2 }
  0x16   : > { %1907 = vmatprep.subr.bf16.mxu0 %v2054_v7  ;;  %481 = vmatpush1.bf16.msra.mxu1 %v2067_v13 }
  0x17   : > { %482 = vmatprep.subr.bf16.mxu1 %v2068_v14 }
  0x19   : > { %1908 = vmatpush3.bf16.msra.mxu0 %v2054_v7 }
  0x1a   : > { %483 = vmatpush1.bf16.msra.mxu1 %v2070_v15  ;;  %1917 = vmatprep.subr.bf16.mxu0 %v2148_v39 }
  0x1b   : > { %1935 = vmatprep.subr.bf16.mxu1 %v2148_v39 }
  0x1c   : > { %1910 = vmatmul.mubr.msk.bf16.vlgmr.msra.gmra.mxu0 %vm316_vm0, %v2056_v8 }
  0x1d   : > { %1913 = vmatprep.mubr.msk.bf16.mxu0 %vm316_vm0, %v2057_v9 }
  0x24   : > { %1914 = vmatmul.mubr.msk.bf16.gmra.mxu0 %vm316_vm0, %v2058_v10 }
  0x25   : > { %1919 = vmatprep.mubr.msk.bf16.mxu0 %vm2149_vm1, %v2148_v39 }
  0xdc   : > { %v1911_v17 = vpop.f32.mrf.mxu0 }
  0xdd   : > { %v398_v30 = vadd.f32 %v1911_v17, %v394_v20 }
  0xde   : > { %v363_v18 = vpop.f32.mrf.mxu0 }
  0xdf   : > { %v396_v23 = vadd.f32 %v394_v20, %v363_v18 }
  0xe0   : > { %v1912_v19 = vpop.f32.mrf.mxu0 }
  0xe1   : > { %v399_v28 = vadd.f32 %v1912_v19, %v395_v21 }
  0xe2   : > { %v366_v22 = vpop.f32.mrf.mxu0 }
  0xe3   : > { %v397_v24 = vadd.f32 %v395_v21, %v366_v22  ;;  %v405_v31 = vpack.c.bf16 %v399_v28, %v398_v30 }
  0xe4   : > { %v1915_v25 = vpop.f32.mrf.mxu0 }
  0xe5   : > { %v404_v26 = vpack.c.bf16 %v397_v24, %v396_v23  ;;  %v402_v36 = vadd.f32 %v1915_v25, %v394_v20 }
  0xe6   : > { %v379_v27 = vpop.f32.mrf.mxu0 }
  0xe7   : > { %1810 = vmatmul.mubr.msk.bf16.vlgmr.msra.gmra.mxu1 %vm316_vm0, %v404_v26  ;;  %v400_v33 = vadd.f32 %v394_v20, %v379_v27 }
  0xe8   : > { %510 = vmatprep.mubr.bf16.mxu1 %v2147_v16  ;;  %v1916_v29 = vpop.f32.mrf.mxu0 }
  0xe9   : > { %v403_v37 = vadd.f32 %v1916_v29, %v395_v21 }
  0xea   : > { %v382_v32 = vpop.f32.mrf.mxu0 }
  0xeb   : > { %v401_v34 = vadd.f32 %v395_v21, %v382_v32  ;;  %v407_v38 = vpack.c.bf16 %v403_v37, %v402_v36 }
  0xed   : > { %v406_v35 = vpack.c.bf16 %v401_v34, %v400_v33 }
  0xef   : > { %1811 = vmatmul.mubr.msk.bf16.gmra.mxu1 %vm316_vm0, %v405_v31 }
  0xf0   : > { %520 = vmatprep.mubr.bf16.mxu1 %v2147_v16 }
  0xf7   : > { %1812 = vmatmul.mubr.msk.bf16.gmra.mxu1 %vm316_vm0, %v406_v35 }
  0xf8   : > { %530 = vmatprep.mubr.bf16.mxu1 %v2147_v16 }
  0xff   : > { %1813 = vmatmul.mubr.msk.bf16.gmra.mxu1 %vm316_vm0, %v407_v38 }
 0x100   : > { %1937 = vmatprep.mubr.msk.bf16.mxu1 %vm2149_vm1, %v2148_v39 }
 0x1a7   : > { %v502_v40 = vpop.f32.mrf.mxu1 }
 0x1a9   : > { %v504_v41 = vpop.f32.mrf.mxu1 }
 0x1ab   : > { %v506_v42 = vpop.f32.mrf.mxu1 }
 0x1ac   : > { %v2258_v43 = vpack.c.bf16 %v506_v42, %v502_v40 }
 0x1ad   : > { %v508_v44 = vpop.f32.mrf.mxu1 }
 0x1ae   : > { %v2260_v45 = vpack.c.bf16 %v508_v44, %v504_v41  ;;  %546 = vrot.lane.b32.xlu0 %v2258_v43, %s2150_s10 }
 0x1af   : > { %v512_v46 = vpop.f32.mrf.mxu1 }
 0x1b1   : > { %v514_v47 = vpop.f32.mrf.mxu1 }
 0x1b3   : > { %v516_v48 = vpop.f32.mrf.mxu1 }
 0x1b4   : > { %v2263_v49 = vpack.c.bf16 %v516_v48, %v512_v46 }
 0x1b5   : > { %v518_v50 = vpop.f32.mrf.mxu1 }
 0x1b6   : > { %v2265_v51 = vpack.c.bf16 %v518_v50, %v514_v47  ;;  %597 = vrot.lane.b32.xlu0 %v2263_v49, %s2150_s10 }
 0x1b7   : > { %v522_v52 = vpop.f32.mrf.mxu1 }
 0x1b9   : > { %v524_v53 = vpop.f32.mrf.mxu1 }
 0x1bb   : > { %v526_v54 = vpop.f32.mrf.mxu1 }
 0x1bc   : > { %v2268_v55 = vpack.c.bf16 %v526_v54, %v522_v52 }
 0x1bd   : > { %v528_v56 = vpop.f32.mrf.mxu1 }
 0x1be   : > { %v2270_v57 = vpack.c.bf16 %v528_v56, %v524_v53  ;;  %647 = vrot.lane.b32.xlu1 %v2268_v55, %s2150_s10 }
 0x1bf   : > { %v532_v58 = vpop.f32.mrf.mxu1 }
 0x1c1   : > { %v2273_v59 = vpop.f32.mrf.mxu1 }
 0x1c3   : > { %v536_v60 = vpop.f32.mrf.mxu1 }
 0x1c4   : > { %v2275_v61 = vpack.c.bf16 %v536_v60, %v532_v58 }
 0x1c5   : > { %v2312_v23 = vpop.f32.mrf.mxu1 }
 0x1c6   : > { %697 = vrot.lane.b32.xlu1 %v2275_v61, %s2150_s10 }
 0x220   : > { %v547_v62 = vpop.permute.xlu0 %546 }
 0x221   : > { %v553_v63 = vsel %vm548_vm2, %v547_v62, 0 }
 0x222   : > { %1918 = vmatpush3.bf16.xpose.msra.mxu0 %v553_v63 }
 0x223   : > { %1923 = vmatprep.subr.bf16.mxu0 %v2148_v39 }
 0x228   : > { %v598_v0 = vpop.permute.xlu0 %597 }
 0x229   : > { %v603_v1 = vsel %vm548_vm2, %v598_v0, 0  ;;  %1920 = vmatmul.mubr.msk.bf16.vlgmr.msra.gmra.mxu0 %vm548_vm2, %v2258_v43 }
 0x22a   : > { %1924 = vmatpush3.bf16.xpose.msra.mxu0 %v603_v1  ;;  %1925 = vmatprep.mubr.msk.bf16.mxu0 %vm2149_vm1, %v2148_v39 }
 0x22b   : > { %1929 = vmatprep.subr.bf16.mxu0 %v2148_v39 }
 0x230   : > { %v648_v2 = vpop.permute.xlu1 %647 }
 0x231   : > { %v653_v3 = vsel %vm548_vm2, %v648_v2, 0  ;;  %1926 = vmatmul.mubr.msk.bf16.vlgmr.msra.gmra.mxu0 %vm548_vm2, %v2263_v49 }
 0x232   : > { %1930 = vmatpush3.bf16.xpose.msra.mxu0 %v653_v3  ;;  %1931 = vmatprep.mubr.msk.bf16.mxu0 %vm2149_vm1, %v2148_v39 }
 0x233   : > { %1941 = vmatprep.subr.bf16.mxu0 %v2148_v39 }
 0x238   : > { %v698_v4 = vpop.permute.xlu1 %697 }
 0x239   : > { %v703_v5 = vsel %vm548_vm2, %v698_v4, 0  ;;  %1932 = vmatmul.mubr.msk.bf16.vlgmr.msra.gmra.mxu0 %vm548_vm2, %v2268_v55 }
 0x23a   : > { %1936 = vmatpush3.bf16.xpose.msra.mxu1 %v703_v5  ;;  %1942 = vmatpush3.bf16.msra.mxu0 %v2260_v45 }
 0x23b   : > { %1947 = vmatprep.subr.bf16.mxu1 %v2148_v39  ;;  %1943 = vmatprep.mubr.msk.bf16.mxu0 %vm2149_vm1, %v2148_v39 }
 0x23c   : > { %1953 = vmatprep.subr.bf16.mxu0 %v2148_v39 }
 0x241   : > { %1938 = vmatmul.mubr.msk.bf16.vlgmr.msra.gmra.mxu1 %vm548_vm2, %v2275_v61 }
 0x242   : > { %1948 = vmatpush3.bf16.msra.mxu1 %v2265_v51  ;;  %1949 = vmatprep.mubr.msk.bf16.mxu1 %vm2149_vm1, %v2148_v39 }
 0x243   : > { %1959 = vmatprep.subr.bf16.mxu1 %v2148_v39 }
 0x2e9   : > { %v589_v6 = vpop.f32.mrf.mxu0 }
 0x2ea   : > { %v747_v7 = vsel %vm746_vm3, %v589_v6, -inf }
 0x2eb   : > { %748 = vmax.xlane.f32.xlu0 %v747_v7  ;;  %v1921_v8 = vpop.f32.mrf.mxu0 }
 0x2ed   : > { %v592_v9 = vpop.f32.mrf.mxu0 }
 0x2ee   : > { %v750_v10 = vsel %vm746_vm3, %v592_v9, -inf }
 0x2ef   : > { %v1922_v11 = vpop.f32.mrf.mxu0  ;;  %751 = vmax.xlane.f32.xlu1 %v750_v10 }
 0x2f1   : > { %v639_v12 = vpop.f32.mrf.mxu0 }
 0x2f2   : > { %v753_v13 = vsel %vm746_vm3, %v639_v12, -inf }
 0x2f3   : > { %754 = vmax.xlane.f32.xlu0 %v753_v13  ;;  %v1927_v14 = vpop.f32.mrf.mxu0 }
 0x2f5   : > { %v642_v15 = vpop.f32.mrf.mxu0 }
 0x2f6   : > { %v756_v16 = vsel %vm746_vm3, %v642_v15, -inf }
 0x2f7   : > { %757 = vmax.xlane.f32.xlu0 %v756_v16  ;;  %v1928_v17 = vpop.f32.mrf.mxu0 }
 0x2f9   : > { %v689_v18 = vpop.f32.mrf.mxu0 }
 0x2fa   : > { %v759_v19 = vsel %vm746_vm3, %v689_v18, -inf }
 0x2fb   : > { %v1933_v20 = vpop.f32.mrf.mxu0  ;;  %760 = vmax.xlane.f32.xlu1 %v759_v19 }
 0x2fd   : > { %v692_v21 = vpop.f32.mrf.mxu0 }
 0x2fe   : > { %v762_v22 = vsel %vm746_vm3, %v692_v21, -inf }
 0x2ff   : > { %763 = vmax.xlane.f32.xlu0 %v762_v22  ;;  %v1934_v24 = vpop.f32.mrf.mxu0 }
 0x301   : > { %v739_v25 = vpop.f32.mrf.mxu1 }
 0x302   : > { %v765_v26 = vsel %vm746_vm3, %v739_v25, -inf }
 0x303   : > { %766 = vmax.xlane.f32.xlu1 %v765_v26  ;;  %v1939_v27 = vpop.f32.mrf.mxu1 }
 0x305   : > { %v742_v28 = vpop.f32.mrf.mxu1 }
 0x306   : > { %v768_v29 = vsel %vm746_vm3, %v742_v28, -inf }
 0x307   : > { %769 = vmax.xlane.f32.xlu0 %v768_v29  ;;  %v1940_v30 = vpop.f32.mrf.mxu1 }
 0x314   : > { %1029 = vrot.lane.b32.xlu1 %v2258_v43, %s2151_s11 }
 0x374   : > { %v749_v31 = vpop.xlane.xlu0 %748 }
 0x375   : > { %v771_v32 = vsub.f32 %v589_v6, %v749_v31 }
 0x377   : > { %v779_v33 = vmul.f32 1.442695, %v771_v32  ;;  %v2350_v32 = vpack.c.bf16 %v2312_v23, %v2273_v59 }
 0x378   : > { %v752_v34 = vpop.xlane.xlu1 %751 }
 0x379   : > { %2075 = vpow2.f32 %v779_v33  ;;  %v772_v35 = vsub.f32 %v592_v9, %v752_v34 }
 0x37b   : > { %v781_v36 = vmul.f32 1.442695, %v772_v35 }
 0x37c   : > { %v755_v37 = vpop.xlane.xlu0 %754 }
 0x37d   : > { %2077 = vpow2.f32 %v781_v36  ;;  %v773_v38 = vsub.f32 %v639_v12, %v755_v37 }
 0x37f   : > { %v783_v40 = vmul.f32 1.442695, %v773_v38 }
 0x380   : > { %v758_v41 = vpop.xlane.xlu0 %757 }
 0x381   : > { %2079 = vpow2.f32 %v783_v40  ;;  %v774_v42 = vsub.f32 %v642_v15, %v758_v41 }
 0x383   : > { %v785_v44 = vmul.f32 1.442695, %v774_v42 }
 0x384   : > { %v761_v46 = vpop.xlane.xlu1 %760 }
 0x385   : > { %2081 = vpow2.f32 %v785_v44  ;;  %v775_v47 = vsub.f32 %v689_v18, %v761_v46 }
 0x386   : > { %v2076_v48 = vpop.eup %2075 }
 0x387   : > { %v787_v50 = vmul.f32 1.442695, %v775_v47  ;;  %v795_v52 = vsel %vm746_vm3, %v2076_v48, 0.0 }
 0x388   : > { %v764_v53 = vpop.xlane.xlu0 %763  ;;  %796 = vadd.xlane.f32.xlu1 %v795_v52 }
 0x389   : > { %2083 = vpow2.f32 %v787_v50  ;;  %v776_v54 = vsub.f32 %v692_v21, %v764_v53 }
 0x38a   : > { %v2078_v56 = vpop.eup %2077 }
 0x38b   : > { %v789_v58 = vmul.f32 1.442695, %v776_v54  ;;  %v798_v60 = vsel %vm746_vm3, %v2078_v56, 0.0 }
 0x38c   : > { %v767_v62 = vpop.xlane.xlu1 %766  ;;  %799 = vadd.xlane.f32.xlu0 %v798_v60 }
 0x38d   : > { %2085 = vpow2.f32 %v789_v58  ;;  %v777_v63 = vsub.f32 %v739_v25, %v767_v62 }
 0x38e   : > { %v2080_v0 = vpop.eup %2079 }
 0x38f   : > { %v791_v1 = vmul.f32 1.442695, %v777_v63  ;;  %v801_v2 = vsel %vm746_vm3, %v2080_v0, 0.0 }
 0x390   : > { %802 = vadd.xlane.f32.xlu1 %v801_v2  ;;  %v770_v3 = vpop.xlane.xlu0 %769  ;;  %v1030_v16 = vpop.permute.xlu1 %1029 }
 0x391   : > { %2087 = vpow2.f32 %v791_v1  ;;  %v778_v4 = vsub.f32 %v742_v28, %v770_v3  ;;  %v1035_v40 = vsel %vm548_vm2, %v1030_v16, 0 }
 0x392   : > { %v2082_v5 = vpop.eup %2081 }
 0x393   : > { %v793_v6 = vmul.f32 1.442695, %v778_v4  ;;  %v804_v7 = vsel %vm746_vm3, %v2082_v5, 0.0 }
 0x394   : > { %805 = vadd.xlane.f32.xlu0 %v804_v7 }
 0x395   : > { %2089 = vpow2.f32 %v793_v6 }
 0x396   : > { %v2084_v8 = vpop.eup %2083 }
 0x397   : > { %v807_v9 = vsel %vm746_vm3, %v2084_v8, 0.0 }
 0x398   : > { %808 = vadd.xlane.f32.xlu1 %v807_v9 }
 0x39a   : > { %v2086_v10 = vpop.eup %2085 }
 0x39b   : > { %v810_v11 = vsel %vm746_vm3, %v2086_v10, 0.0 }
 0x39c   : > { %811 = vadd.xlane.f32.xlu0 %v810_v11 }
 0x39e   : > { %v2324_v12 = vpop.eup %2087 }
 0x39f   : > { %v813_v13 = vsel %vm746_vm3, %v2324_v12, 0.0 }
 0x3a0   : > { %814 = vadd.xlane.f32.xlu1 %v813_v13 }
 0x3a2   : > { %v2090_v14 = vpop.eup %2089 }
 0x3a3   : > { %v816_v15 = vsel %vm746_vm3, %v2090_v14, 0.0 }
 0x3a4   : > { %817 = vadd.xlane.f32.xlu0 %v816_v15 }
 0x3b1   : > { %1027 = vrot.lane.b32.xlu1 %v2258_v43, %s2152_s12 }
 0x3b5   : > { %1131 = vrot.lane.b32.xlu1 %v2268_v55, %s2151_s11 }
 0x3b9   : > { %1182 = vrot.lane.b32.xlu1 %v2275_v61, %s2151_s11 }
 0x3ba   : > { %1080 = vrot.lane.b32.xlu0 %v2263_v49, %s2151_s11 }
 0x3bd   : > { %1180 = vrot.lane.b32.xlu1 %v2275_v61, %s2152_s12 }
 0x3be   : > { %1078 = vrot.lane.b32.xlu0 %v2263_v49, %s2152_s12 }
 0x3c2   : > { %1129 = vrot.lane.b32.xlu0 %v2268_v55, %s2152_s12 }
 0x411   : > { %v797_v43 = vpop.xlane.xlu1 %796 }
 0x412   : > { %2091 = vrcp.f32 %v797_v43 }
 0x415   : > { %v800_v17 = vpop.xlane.xlu0 %799 }
 0x416   : > { %2093 = vrcp.f32 %v800_v17 }
 0x419   : > { %v803_v18 = vpop.xlane.xlu1 %802 }
 0x41a   : > { %2095 = vrcp.f32 %v803_v18 }
 0x41d   : > { %v806_v19 = vpop.xlane.xlu0 %805 }
 0x41e   : > { %2097 = vrcp.f32 %v806_v19 }
 0x41f   : > { %v2092_v20 = vpop.eup %2091 }
 0x420   : > { %v827_v61 = vmul.f32 %v2092_v20, %v2076_v48 }
 0x421   : > { %v809_v21 = vpop.xlane.xlu1 %808 }
 0x422   : > { %2099 = vrcp.f32 %v809_v21 }
 0x423   : > { %v2094_v22 = vpop.eup %2093 }
 0x424   : > { %v828_v24 = vmul.f32 %v2094_v22, %v2078_v56 }
 0x425   : > { %v812_v25 = vpop.xlane.xlu0 %811 }
 0x426   : > { %2101 = vrcp.f32 %v812_v25  ;;  %v835_v49 = vpack.c.bf16 %v828_v24, %v827_v61 }
 0x427   : > { %v2096_v55 = vpop.eup %2095 }
 0x428   : > { %1944 = vmatmul.mubr.msk.bf16.vlgmr.msra.gmra.mxu0 %vm746_vm3, %v835_v49  ;;  %v829_v28 = vmul.f32 %v2096_v55, %v2080_v0 }
 0x429   : > { %1954 = vmatpush3.bf16.msra.mxu0 %v2270_v57  ;;  %v815_v26 = vpop.xlane.xlu1 %814  ;;  %1955 = vmatprep.mubr.msk.bf16.mxu0 %vm2149_vm1, %v2148_v39 }
 0x42a   : > { %1965 = vmatprep.subr.bf16.mxu0 %v2148_v39  ;;  %2103 = vrcp.f32 %v815_v26 }
 0x42b   : > { %v2098_v27 = vpop.eup %2097 }
 0x42c   : > { %v830_v29 = vmul.f32 %v2098_v27, %v2082_v5 }
 0x42d   : > { %v818_v30 = vpop.xlane.xlu0 %817  ;;  %v1028_v38 = vpop.permute.xlu1 %1027 }
 0x42e   : > { %2105 = vrcp.f32 %v818_v30  ;;  %v836_v31 = vpack.c.bf16 %v830_v29, %v829_v28 }
 0x42f   : > { %v2100_v33 = vpop.eup %2099 }
 0x430   : > { %1950 = vmatmul.mubr.msk.bf16.vlgmr.msra.gmra.mxu1 %vm746_vm3, %v836_v31  ;;  %v831_v35 = vmul.f32 %v2100_v33, %v2084_v8 }
 0x431   : > { %1960 = vmatpush3.bf16.msra.mxu1 %v2350_v32  ;;  %1961 = vmatprep.mubr.msk.bf16.mxu1 %vm2149_vm1, %v2148_v39  ;;  %v1081_v41 = vpop.permute.xlu0 %1080  ;;  %v1132_v46 = vpop.permute.xlu1 %1131 }
 0x432   : > { %1971 = vmatprep.subr.bf16.mxu1 %v2148_v39  ;;  %v1137_v48 = vsel %vm548_vm2, %v1132_v46, 0  ;;  %v1086_v50 = vsel %vm548_vm2, %v1081_v41, 0 }
 0x433   : > { %v2102_v34 = vpop.eup %2101 }
 0x434   : > { %v832_v36 = vmul.f32 %v2102_v34, %v2086_v10 }
 0x435   : > { %v1079_v52 = vpop.permute.xlu0 %1078  ;;  %v1183_v53 = vpop.permute.xlu1 %1182 }
 0x436   : > { %v837_v37 = vpack.c.bf16 %v832_v36, %v831_v35  ;;  %v1188_v56 = vsel %vm548_vm2, %v1183_v53, 0 }
 0x437   : > { %v2104_v59 = vpop.eup %2103 }
 0x438   : > { %1956 = vmatmul.mubr.msk.bf16.vlgmr.msra.gmra.mxu0 %vm746_vm3, %v837_v37  ;;  %v833_v42 = vmul.f32 %v2104_v59, %v2324_v12 }
 0x439   : > { %1966 = vmatpush3.bf16.xpose.msra.mxu0 %v1035_v40  ;;  %1967 = vmatprep.mubr.msk.bf16.mxu0 %vm2149_vm1, %v2148_v39  ;;  %v1130_v54 = vpop.permute.xlu0 %1129  ;;  %v1181_v58 = vpop.permute.xlu1 %1180 }
 0x43a   : > { %1977 = vmatprep.subr.bf16.mxu0 %v2148_v39 }
 0x43b   : > { %v2106_v23 = vpop.eup %2105 }
 0x43c   : > { %v834_v44 = vmul.f32 %v2106_v23, %v2090_v14 }
 0x43e   : > { %v838_v47 = vpack.c.bf16 %v834_v44, %v833_v42 }
 0x440   : > { %1962 = vmatmul.mubr.msk.bf16.vlgmr.msra.gmra.mxu1 %vm746_vm3, %v838_v47  ;;  %1968 = vmatmul.mubr.msk.bf16.vlgmr.msra.gmra.mxu0 %vm548_vm2, %v1028_v38 }
 0x441   : > { %1972 = vmatpush3.bf16.xpose.msra.mxu1 %v1086_v50  ;;  %1978 = vmatpush3.bf16.xpose.msra.mxu0 %v1137_v48 }
 0x442   : > { %1973 = vmatprep.mubr.msk.bf16.mxu1 %vm2149_vm1, %v2148_v39  ;;  %1979 = vmatprep.mubr.msk.bf16.mxu0 %vm2149_vm1, %v2148_v39 }
 0x443   : > { %1983 = vmatprep.subr.bf16.mxu1 %v2148_v39  ;;  %1989 = vmatprep.subr.bf16.mxu0 %v2148_v39 }
 0x448   : > { %1974 = vmatmul.mubr.msk.bf16.vlgmr.msra.gmra.mxu1 %vm548_vm2, %v1079_v52  ;;  %1980 = vmatmul.mubr.msk.bf16.vlgmr.msra.gmra.mxu0 %vm548_vm2, %v1130_v54 }
 0x449   : > { %1984 = vmatpush3.bf16.xpose.msra.mxu1 %v1188_v56  ;;  %1985 = vmatprep.mubr.msk.bf16.mxu1 %vm2149_vm1, %v2148_v39 }
 0x44a   : > { %1991 = vmatprep.mubr.msk.bf16.mxu0 %vm2149_vm1, %v2148_v39  ;;  %1995 = vmatprep.subr.bf16.mxu1 %v2148_v39 }
 0x450   : > { %1986 = vmatmul.mubr.msk.bf16.vlgmr.msra.gmra.mxu1 %vm548_vm2, %v1181_v58 }
 0x451   : > { %1997 = vmatprep.mubr.msk.bf16.mxu1 %vm2149_vm1, %v2148_v39 }
 0x4e8   : > { %v2384_v60 = vpop.f32.mrf.mxu0 }
 0x4ea   : > { %v1945_v62 = vpop.f32.mrf.mxu0 }
 0x4ec   : > { %v2386_v63 = vpop.f32.mrf.mxu0 }
 0x4ed   : > { %v1019_v0 = vpack.c.bf16 %v2386_v63, %v2384_v60  ;;  %v2074_v60 = vld [vmem:[%s2506_s4 + $0x10] sm:$0xff]  }
 0x4ee   : > { %v1946_v1 = vpop.f32.mrf.mxu0 }
 0x4f0   : > { %v2390_v2 = vpop.f32.mrf.mxu1 }
 0x4f2   : > { %v1951_v3 = vpop.f32.mrf.mxu1 }
 0x4f4   : > { %v2392_v4 = vpop.f32.mrf.mxu1 }
 0x4f5   : > { %v1020_v5 = vpack.c.bf16 %v2392_v4, %v2390_v2 }
 0x4f6   : > { %v1952_v6 = vpop.f32.mrf.mxu1 }
 0x4f8   : > { %v2396_v7 = vpop.f32.mrf.mxu0 }
 0x4fa   : > { %v1957_v8 = vpop.f32.mrf.mxu0 }
 0x4fc   : > { %v2398_v9 = vpop.f32.mrf.mxu0 }
 0x4fd   : > { %v1021_v10 = vpack.c.bf16 %v2398_v9, %v2396_v7 }
 0x4fe   : > { %v1958_v11 = vpop.f32.mrf.mxu0 }
 0x500   : > { %v2402_v12 = vpop.f32.mrf.mxu1  ;;  %v1071_v13 = vpop.f32.mrf.mxu0 }
 0x501   : > { %v1231_v14 = vsel %vm746_vm3, %v1071_v13, -inf }
 0x502   : > { %1232 = vmax.xlane.f32.xlu0 %v1231_v14  ;;  %v1963_v15 = vpop.f32.mrf.mxu1  ;;  %v1969_v16 = vpop.f32.mrf.mxu0 }
 0x504   : > { %v2405_v43 = vpop.f32.mrf.mxu1  ;;  %v1074_v17 = vpop.f32.mrf.mxu0 }
 0x505   : > { %v1022_v18 = vpack.c.bf16 %v2405_v43, %v2402_v12  ;;  %v1234_v19 = vsel %vm746_vm3, %v1074_v17, -inf }
 0x506   : > { %1235 = vmax.xlane.f32.xlu1 %v1234_v19  ;;  %v1964_v20 = vpop.f32.mrf.mxu1  ;;  %v1970_v21 = vpop.f32.mrf.mxu0 }
 0x508   : > { %v1122_v22 = vpop.f32.mrf.mxu1  ;;  %v1173_v61 = vpop.f32.mrf.mxu0 }
 0x509   : > { %v1243_v24 = vsel %vm746_vm3, %v1173_v61, -inf  ;;  %v1237_v25 = vsel %vm746_vm3, %v1122_v22, -inf }
 0x50a   : > { %1244 = vmax.xlane.f32.xlu1 %v1243_v24  ;;  %v1981_v49 = vpop.f32.mrf.mxu0  ;;  %1238 = vmax.xlane.f32.xlu0 %v1237_v25  ;;  %v1975_v55 = vpop.f32.mrf.mxu1 }
 0x50c   : > { %v1125_v26 = vpop.f32.mrf.mxu1  ;;  %v1176_v27 = vpop.f32.mrf.mxu0 }
 0x50d   : > { %v1240_v28 = vsel %vm746_vm3, %v1125_v26, -inf  ;;  %v1246_v33 = vsel %vm746_vm3, %v1176_v27, -inf }
 0x50e   : > { %v1982_v29 = vpop.f32.mrf.mxu0  ;;  %1241 = vmax.xlane.f32.xlu0 %v1240_v28  ;;  %v1976_v30 = vpop.f32.mrf.mxu1 }
 0x510   : > { %v1224_v31 = vpop.f32.mrf.mxu1 }
 0x511   : > { %v1249_v34 = vsel %vm746_vm3, %v1224_v31, -inf }
 0x512   : > { %1247 = vmax.xlane.f32.xlu0 %v1246_v33  ;;  %1250 = vmax.xlane.f32.xlu1 %v1249_v34  ;;  %v1987_v35 = vpop.f32.mrf.mxu1 }
 0x514   : > { %v1227_v36 = vpop.f32.mrf.mxu1 }
 0x515   : > { %v1252_v37 = vsel %vm746_vm3, %v1227_v36, -inf }
 0x516   : > { %1253 = vmax.xlane.f32.xlu0 %v1252_v37  ;;  %v1988_v38 = vpop.f32.mrf.mxu1 }
 0x523   : > { %1324 = vrot.lane.b32.xlu1 %v2260_v45, %s2152_s12 }
 0x58b   : > { %v1233_v40 = vpop.xlane.xlu0 %1232 }
 0x58c   : > { %v1255_v59 = vsub.f32 %v1071_v13, %v1233_v40 }
 0x58e   : > { %v1263_v23 = vmul.f32 1.442695, %v1255_v59 }
 0x58f   : > { %v1236_v41 = vpop.xlane.xlu1 %1235 }
 0x590   : > { %2107 = vpow2.f32 %v1263_v23  ;;  %v1256_v42 = vsub.f32 %v1074_v17, %v1236_v41 }
 0x592   : > { %v1265_v44 = vmul.f32 1.442695, %v1256_v42 }
 0x593   : > { %v1245_v46 = vpop.xlane.xlu1 %1244  ;;  %v1239_v47 = vpop.xlane.xlu0 %1238 }
 0x594   : > { %2109 = vpow2.f32 %v1265_v44  ;;  %v1259_v48 = vsub.f32 %v1173_v61, %v1245_v46  ;;  %v1257_v50 = vsub.f32 %v1122_v22, %v1239_v47 }
 0x596   : > { %v1267_v52 = vmul.f32 1.442695, %v1257_v50  ;;  %v1271_v53 = vmul.f32 1.442695, %v1259_v48 }
 0x597   : > { %v1242_v54 = vpop.xlane.xlu0 %1241 }
 0x598   : > { %v1258_v56 = vsub.f32 %v1125_v26, %v1242_v54  ;;  %2111 = vpow2.f32 %v1267_v52 }
 0x599   : > { %2113 = vpow2.f32 %v1271_v53  ;;  %v2071_v53 = vld [vmem:[%s2506_s4 + $0x8] sm:$0xff]  }
 0x59a   : > { %v1269_v58 = vmul.f32 1.442695, %v1258_v56 }
 0x59b   : > { %v1248_v45 = vpop.xlane.xlu0 %1247  ;;  %v1251_v62 = vpop.xlane.xlu1 %1250 }
 0x59c   : > { %2115 = vpow2.f32 %v1269_v58  ;;  %v1260_v1 = vsub.f32 %v1176_v27, %v1248_v45  ;;  %v1261_v3 = vsub.f32 %v1224_v31, %v1251_v62 }
 0x59d   : > { %v2108_v6 = vpop.eup %2107 }
 0x59e   : > { %v1273_v8 = vmul.f32 1.442695, %v1260_v1  ;;  %v1275_v11 = vmul.f32 1.442695, %v1261_v3  ;;  %v1279_v13 = vsel %vm746_vm3, %v2108_v6, 0.0 }
 0x59f   : > { %1280 = vadd.xlane.f32.xlu1 %v1279_v13  ;;  %v1325_v14 = vpop.permute.xlu1 %1324  ;;  %v1254_v15 = vpop.xlane.xlu0 %1253  ;;  %v2072_v13 = vld [vmem:[%s2506_s4] sm:$0xff]  }
 0x5a0   : > { %2117 = vpow2.f32 %v1273_v8  ;;  %v1262_v16 = vsub.f32 %v1227_v36, %v1254_v15  ;;  %1990 = vmatpush3.bf16.msra.mxu0 %v1325_v14 }
 0x5a1   : > { %v2110_v17 = vpop.eup %2109  ;;  %2119 = vpow2.f32 %v1275_v11  ;;  %2001 = vmatprep.subr.bf16.mxu0 %v2148_v39 }
 0x5a2   : > { %v1277_v19 = vmul.f32 1.442695, %v1262_v16  ;;  %v1282_v20 = vsel %vm746_vm3, %v2110_v17, 0.0 }
 0x5a3   : > { %1283 = vadd.xlane.f32.xlu0 %v1282_v20 }
 0x5a4   : > { %2121 = vpow2.f32 %v1277_v19 }
 0x5a5   : > { %v2112_v21 = vpop.eup %2111 }
 0x5a6   : > { %v1285_v22 = vsel %vm746_vm3, %v2112_v21, 0.0  ;;  %v2114_v61 = vpop.eup %2113 }
 0x5a7   : > { %1286 = vadd.xlane.f32.xlu1 %v1285_v22  ;;  %v1291_v49 = vsel %vm746_vm3, %v2114_v61, 0.0 }
 0x5a9   : > { %v2116_v24 = vpop.eup %2115 }
 0x5aa   : > { %v1288_v25 = vsel %vm746_vm3, %v2116_v24, 0.0 }
 0x5ab   : > { %1289 = vadd.xlane.f32.xlu0 %v1288_v25  ;;  %1292 = vadd.xlane.f32.xlu1 %v1291_v49 }
 0x5ad   : > { %v2118_v55 = vpop.eup %2117 }
 0x5ae   : > { %v2120_v26 = vpop.eup %2119  ;;  %v1294_v27 = vsel %vm746_vm3, %v2118_v55, 0.0 }
 0x5af   : > { %v1297_v28 = vsel %vm746_vm3, %v2120_v26, 0.0  ;;  %1295 = vadd.xlane.f32.xlu0 %v1294_v27  ;;  %v1846_v27 = vld [vmem:[%s2507_s5] ss:$0 sm:$0xff] }
 0x5b0   : > { %1298 = vadd.xlane.f32.xlu1 %v1297_v28 }
 0x5b1   : > { %v2122_v29 = vpop.eup %2121 }
 0x5b2   : > { %v1300_v30 = vsel %vm746_vm3, %v2122_v29, 0.0 }
 0x5b3   : > { %1301 = vadd.xlane.f32.xlu0 %v1300_v30 }
 0x5c1   : > { %1420 = vrot.lane.b32.xlu1 %v2270_v57, %s2152_s12 }
 0x5c5   : > { %1468 = vrot.lane.b32.xlu1 %v2350_v32, %s2152_s12 }
 0x5c9   : > { %1372 = vrot.lane.b32.xlu0 %v2265_v51, %s2152_s12 }
 0x628   : > { %v1281_v31 = vpop.xlane.xlu1 %1280 }
 0x629   : > { %2123 = vrcp.f32 %v1281_v31 }
 0x62c   : > { %v1284_v33 = vpop.xlane.xlu0 %1283 }
 0x62d   : > { %2125 = vrcp.f32 %v1284_v33 }
 0x630   : > { %v1287_v34 = vpop.xlane.xlu1 %1286 }
 0x631   : > { %2127 = vrcp.f32 %v1287_v34 }
 0x634   : > { %v1290_v35 = vpop.xlane.xlu0 %1289  ;;  %v1293_v36 = vpop.xlane.xlu1 %1292 }
 0x635   : > { %2129 = vrcp.f32 %v1290_v35 }
 0x636   : > { %2131 = vrcp.f32 %v1293_v36  ;;  %v2124_v37 = vpop.eup %2123 }
 0x637   : > { %v1311_v32 = vmul.f32 %v2124_v37, %v2108_v6 }
 0x638   : > { %v1296_v38 = vpop.xlane.xlu0 %1295 }
 0x639   : > { %v1299_v40 = vpop.xlane.xlu1 %1298  ;;  %2133 = vrcp.f32 %v1296_v38 }
 0x63a   : > { %v2126_v57 = vpop.eup %2125  ;;  %2135 = vrcp.f32 %v1299_v40 }
 0x63b   : > { %v1312_v59 = vmul.f32 %v2126_v57, %v2110_v17 }
 0x63c   : > { %v1302_v23 = vpop.xlane.xlu0 %1301 }
 0x63d   : > { %2137 = vrcp.f32 %v1302_v23  ;;  %v1319_v51 = vpack.c.bf16 %v1312_v59, %v1311_v32  ;;  %v1421_v41 = vpop.permute.xlu1 %1420 }
 0x63e   : > { %v2128_v42 = vpop.eup %2127 }
 0x63f   : > { %1992 = vmatmul.mubr.msk.bf16.vlgmr.msra.gmra.mxu0 %vm746_vm3, %v1319_v51  ;;  %v1313_v47 = vmul.f32 %v2128_v42, %v2112_v21 }
 0x640   : > { %2002 = vmatpush3.bf16.msra.mxu0 %v1421_v41  ;;  %v1373_v44 = vpop.permute.xlu0 %1372  ;;  %2003 = vmatprep.mubr.msk.bf16.mxu0 %vm2149_vm1, %v2148_v39 }
 0x641   : > { %1996 = vmatpush3.bf16.msra.mxu1 %v1373_v44  ;;  %v1469_v56 = vpop.permute.xlu1 %1468 }
 0x642   : > { %v2130_v46 = vpop.eup %2129  ;;  %2007 = vmatprep.subr.bf16.mxu1 %v2148_v39 }
 0x643   : > { %v1314_v48 = vmul.f32 %v2130_v46, %v2116_v24  ;;  %v2132_v50 = vpop.eup %2131 }
 0x644   : > { %v1315_v58 = vmul.f32 %v2132_v50, %v2114_v61 }
 0x645   : > { %v1320_v52 = vpack.c.bf16 %v1314_v48, %v1313_v47 }
 0x646   : > { %v2134_v54 = vpop.eup %2133 }
 0x647   : > { %1998 = vmatmul.mubr.msk.bf16.vlgmr.msra.gmra.mxu1 %vm746_vm3, %v1320_v52  ;;  %v1316_v45 = vmul.f32 %v2134_v54, %v2118_v55  ;;  %v2136_v62 = vpop.eup %2135 }
 0x648   : > { %2008 = vmatpush3.bf16.msra.mxu1 %v1469_v56  ;;  %2009 = vmatprep.mubr.msk.bf16.mxu1 %vm2149_vm1, %v2148_v39  ;;  %v1317_v6 = vmul.f32 %v2136_v62, %v2120_v26  ;;  %v2073_v39 = vld [vmem:[%s2506_s4 + $0x18] sm:$0xff]  }
 0x649   : > { %v1321_v1 = vpack.c.bf16 %v1316_v45, %v1315_v58  ;;  %2025 = vmatprep.subr.bf16.mxu1 %v2071_v53  ;;  %2013 = vmatprep.subr.bf16.mxu0 %v2073_v39 }
 0x64a   : > { %v2138_v3 = vpop.eup %2137 }
 0x64b   : > { %2004 = vmatmul.mubr.msk.bf16.vlgmr.msra.gmra.mxu0 %vm746_vm3, %v1321_v1  ;;  %v1318_v8 = vmul.f32 %v2138_v3, %v2122_v29 }
 0x64c   : > { %2014 = vmatpush3.bf16.msra.mxu0 %v2073_v39 }
 0x64d   : > { %v1322_v11 = vpack.c.bf16 %v1318_v8, %v1317_v6  ;;  %2015 = vmatprep.subr.bf16.mxu0 %v2074_v60 }
 0x64f   : > { %2010 = vmatmul.mubr.msk.bf16.vlgmr.msra.gmra.mxu1 %vm746_vm3, %v1322_v11 }
 0x650   : > { %2026 = vmatpush3.bf16.msra.mxu1 %v2071_v53  ;;  %2029 = vmatprep.mubr.msk.bf16.mxu1 %vm548_vm2, %v1019_v0 }
 0x651   : > { %2027 = vmatprep.subr.bf16.mxu1 %v2072_v13  ;;  %2016 = vmatpush3.bf16.msra.mxu0 %v2074_v60 }
 0x654   : > { %2028 = vmatpush3.bf16.msra.mxu1 %v2072_v13 }
 0x657   : > { %2030 = vmatmul.mubr.msk.bf16.vlgmr.msra.gmra.mxu1 %vm548_vm2, %v1020_v5 }
 0x658   : > { %2033 = vmatprep.mubr.msk.bf16.mxu1 %vm548_vm2, %v1021_v10 }
 0x65f   : > { %2034 = vmatmul.mubr.msk.bf16.gmra.mxu1 %vm548_vm2, %v1022_v18 }
 0x6ff   : > { %v1364_v63 = vpop.f32.mrf.mxu0 }
 0x701   : > { %v1993_v0 = vpop.f32.mrf.mxu0 }
 0x703   : > { %v1367_v2 = vpop.f32.mrf.mxu0 }
 0x704   : > { %v1515_v4 = vpack.c.bf16 %v1367_v2, %v1364_v63 }
 0x705   : > { %v1994_v5 = vpop.f32.mrf.mxu0 }
 0x706   : > { %2017 = vmatprep.mubr.msk.bf16.mxu0 %vm548_vm2, %v1515_v4 }
 0x707   : > { %v1412_v7 = vpop.f32.mrf.mxu1 }
 0x709   : > { %v1999_v9 = vpop.f32.mrf.mxu1 }
 0x70b   : > { %v1415_v10 = vpop.f32.mrf.mxu1  ;;  %v1460_v12 = vpop.f32.mrf.mxu0 }
 0x70c   : > { %v1516_v43 = vpack.c.bf16 %v1415_v10, %v1412_v7 }
 0x70d   : > { %v2000_v18 = vpop.f32.mrf.mxu1  ;;  %v2005_v14 = vpop.f32.mrf.mxu0 }
 0x70e   : > { %2018 = vmatmul.mubr.msk.bf16.vlgmr.msra.gmra.mxu0 %vm548_vm2, %v1516_v43 }
 0x70f   : > { %v1463_v15 = vpop.f32.mrf.mxu0  ;;  %v1508_v16 = vpop.f32.mrf.mxu1 }
 0x710   : > { %v1517_v17 = vpack.c.bf16 %v1463_v15, %v1460_v12 }
 0x711   : > { %v2006_v19 = vpop.f32.mrf.mxu0  ;;  %v2011_v20 = vpop.f32.mrf.mxu1 }
 0x712   : > { %2021 = vmatprep.mubr.msk.bf16.mxu0 %vm548_vm2, %v1517_v17 }
 0x713   : > { %v1511_v21 = vpop.f32.mrf.mxu1 }
 0x714   : > { %v1518_v22 = vpack.c.bf16 %v1511_v21, %v1508_v16 }
 0x715   : > { %v2012_v61 = vpop.f32.mrf.mxu1 }
 0x716   : > { %2022 = vmatmul.mubr.msk.bf16.gmra.mxu0 %vm548_vm2, %v1518_v22 }
 0x717   : > { %v2031_v24 = vpop.f32.mrf.mxu1 }
 0x719   : > { %v1671_v25 = vpop.f32.mrf.mxu1 }
 0x71b   : > { %v2032_v49 = vpop.f32.mrf.mxu1 }
 0x71d   : > { %v1674_v55 = vpop.f32.mrf.mxu1 }
 0x71f   : > { %v2035_v29 = vpop.f32.mrf.mxu1 }
 0x721   : > { %v1687_v37 = vpop.f32.mrf.mxu1 }
 0x723   : > { %v2036_v51 = vpop.f32.mrf.mxu1 }
 0x725   : > { %v1690_v50 = vpop.f32.mrf.mxu1 }
 0x7ce   : > { %v2019_v26 = vpop.f32.mrf.mxu0 }
 0x7cf   : > { %v1680_v28 = vadd.f32 %v2031_v24, %v2019_v26 }
 0x7d0   : > { %v1582_v30 = vpop.f32.mrf.mxu0 }
 0x7d1   : > { %v1711_v31 = vadd.f32 %v1846_v27, %v1680_v28  ;;  %v1672_v33 = vadd.f32 %v1671_v25, %v1582_v30 }
 0x7d2   : > { %v2020_v34 = vpop.f32.mrf.mxu0 }
 0x7d3   : > { %1719 = vst.msk [vmem:[%s2481_s28 + $0x10] sm:$0xff] %vm316_vm0, %v1711_v31  ;;  %v1709_v35 = vadd.f32 %v1846_v27, %v1672_v33  ;;  %v1683_v36 = vadd.f32 %v2032_v49, %v2020_v34 }
 0x7d4   : > { %v1585_v38 = vpop.f32.mrf.mxu0 }
 0x7d5   : > { %1717 = vst.msk [vmem:[%s2481_s28] sm:$0xff] %vm316_vm0, %v1709_v35  ;;  %v1712_v40 = vadd.f32 %v1846_v27, %v1683_v36  ;;  %v1675_v57 = vadd.f32 %v1674_v55, %v1585_v38 }
 0x7d6   : > { %v2023_v32 = vpop.f32.mrf.mxu0 }
 0x7d7   : > { %1720 = vst.msk [vmem:[%s2481_s28 + $0x18] sm:$0xff] %vm316_vm0, %v1712_v40  ;;  %v1710_v59 = vadd.f32 %v1846_v27, %v1675_v57  ;;  %v1696_v23 = vadd.f32 %v2035_v29, %v2023_v32 }
 0x7d8   : > { %v1598_v41 = vpop.f32.mrf.mxu0 }
 0x7d9   : > { %1718 = vst.msk [vmem:[%s2481_s28 + $0x8] sm:$0xff] %vm316_vm0, %v1710_v59  ;;  %v1715_v42 = vadd.f32 %v1846_v27, %v1696_v23  ;;  %v1688_v44 = vadd.f32 %v1687_v37, %v1598_v41 }
 0x7da   : > { %v2024_v46 = vpop.f32.mrf.mxu0 }
 0x7db   : > { %1723 = vst.msk [vmem:[%s2481_s28 + $0x30] sm:$0xff] %vm316_vm0, %v1715_v42  ;;  %v1713_v47 = vadd.f32 %v1846_v27, %v1688_v44  ;;  %v1699_v48 = vadd.f32 %v2036_v51, %v2024_v46 }
 0x7dc   : > { %v1601_v52 = vpop.f32.mrf.mxu0 }
 0x7dd   : > { %1721 = vst.msk [vmem:[%s2481_s28 + $0x20] sm:$0xff] %vm316_vm0, %v1713_v47  ;;  %v1716_v53 = vadd.f32 %v1846_v27, %v1699_v48  ;;  %v1691_v54 = vadd.f32 %v1690_v50, %v1601_v52 }
 0x7df   : > { %1724 = vst.msk [vmem:[%s2481_s28 + $0x38] sm:$0xff] %vm316_vm0, %v1716_v53  ;;  %v1714_v56 = vadd.f32 %v1846_v27, %v1691_v54 }
 0x7e1   : > { %1722 = vst.msk [vmem:[%s2481_s28 + $0x28] sm:$0xff] %vm316_vm0, %v1714_v56 }
 0x7e2 PF: > { %s16_s21 = sadd.s32 1, %s2145_s21  }
 0x7e3   : > { %p13_p4 = scmp.ge.s32.totalorder %s16_s21, 4  }
 0x7e5   :  { %15 = sbr.rel (!%p13_p4) target bundleno = 1 (0x1), region = 75 }

</bundles_post_ra>
